<compile_context>
chip_gen: v7x
topology: tpu7x:2x2x1
jax: 0.10.0
libtpu: 0.0.40
codegen_flags: <defaults>
</compile_context>

<pallas_src>
import functools

import jax
import jax.numpy as jnp
from jax.experimental import pallas as pl
from jax.experimental.pallas import tpu as pltpu


def _round_up(x, m):
    return -(-x // m) * m


def _num_tensorcores_per_device() -> int:
    """Best-effort TensorCore count per device (megacore split). Fallback 1."""
    try:
        kind = (jax.devices()[0].device_kind or "").lower()
    except Exception:
        return 1
    for tag in ("v4", "v5p", "v7"):   # v4 / v5p megacore, v7x: 2 TCs per chip
        if tag in kind:
            return 2
    return 1


def _ctx_scatter_kernel(ctx_ref, emb_ref, out_ref, bcast_ref, sems, *,
                        n_cls, n_ctx, blk, slab, n_slabs):
    """Write the learnable ctx rows into the (aliased) prompt buffer.

    ctx_ref   : (n_ctx, D) VMEM       -- shared learnable context
    emb_ref   : (n_cls, S, D) HBM     -- aliased to out_ref; SOS/suffix rows
                                         are already in place and untouched
    out_ref   : (n_cls, S, D) HBM     -- output (same buffer as emb_ref)
    bcast_ref : (blk, n_ctx, D) VMEM  -- ctx broadcast over this step's classes
    sems      : DMA semaphores, one per class slab

    Each grid step handles `blk` consecutive classes (the last step is clamped
    so it rewrites a few earlier rows with identical data instead of running
    past n_cls).  Within a step, the scratch is filled slab-by-slab and each
    slab's HBM write DMA is started immediately, so later fills overlap
    in-flight DMAs.
    """
    del emb_ref  # prefix/suffix rows already live in the aliased output buffer

    D = ctx_ref.shape[-1]
    g = pl.program_id(0)
    # Clamp the last (possibly partial) chunk instead of going out of bounds;
    # overlapping rows are rewritten with identical data (benign).
    base = jnp.minimum(g * blk, n_cls - blk)

    ctx = ctx_ref[...].astype(bcast_ref.dtype)

    copies = []
    for s in range(n_slabs):
        lo = s * slab
        sz = min(slab, blk - lo)
        # Fill this slab of the broadcast scratch ...
        bcast_ref[pl.ds(lo, sz), :, :] = jnp.broadcast_to(
            ctx[None, :, :], (sz, n_ctx, D))
        # ... and immediately start its strided HBM write so the next slab's
        # fill overlaps the in-flight DMA.
        dst = out_ref.at[pl.ds(base + lo, sz), pl.ds(1, n_ctx), :]
        cp = pltpu.make_async_copy(bcast_ref.at[pl.ds(lo, sz)], dst, sems.at[s])
        cp.start()
        copies.append(cp)
    for cp in copies:
        cp.wait()


def prompt_learner_forward(ctx, embedding):
    """PromptLearner.forward (class_token_position == 'end').

    `embedding` = clip_model.token_embedding(tokenized_prompts): it already
    contains the prefix (SOS) row and the suffix (class name + EOS + pad)
    rows in their final positions; rows [1:1+n_ctx] are overwritten with the
    learnable ctx.  The buffer is aliased input->output, so the kernel reads
    ctx once and writes only n_cls*n_ctx*D elements.  Donate `embedding` at
    the call site (jax.jit(..., donate_argnums=...)) to make the aliasing a
    true in-place update; otherwise XLA adds a defensive copy (correct but
    costs ~S/n_ctx more HBM traffic than the kernel saves).
    """
    n_ctx, D = ctx.shape
    n_cls, S, D2 = embedding.shape
    assert D2 == D
    assert S > 1 + n_ctx
    # Explicit dtype contract: prompts come out in the embedding dtype.
    ctx = ctx.astype(embedding.dtype)

    itemsize = jnp.dtype(embedding.dtype).itemsize
    # Physical (padded) VMEM footprint of one (n_ctx, D) class slab:
    # sublane tile is 8 (f32) / 16 (bf16) / 32 (int8,fp8); lanes pad to 128.
    sublane = 8 * max(1, 4 // itemsize)
    pad_ctx = _round_up(n_ctx, sublane)
    pad_d = _round_up(D, 128)
    cls_bytes = pad_ctx * pad_d * itemsize

    # Per-grid-step padded scratch cap.  20 MiB fits under every generation's
    # per-TC VMEM once vmem_limit_bytes is raised below (v5e/v6e 128 MiB
    # physical; v7x 64 MiB physical per TC, 32 MiB scoped default).
    scratch_budget = 20 << 20
    c_blk_budget = max(1, scratch_budget // cls_bytes)
    min_chunks = -(-n_cls // c_blk_budget)

    # Split classes across TensorCores on megacore / dual-TC parts; keep a
    # single grid step on single-TC parts (extra steps are pure overhead).
    n_tc = _num_tensorcores_per_device()
    n_grid = max(min_chunks, min(n_cls, n_tc))
    blk = -(-n_cls // n_grid)             # classes handled per grid step

    # Sub-slab size for fill/DMA overlap (~2 MiB padded per slab).
    slab = max(1, min(blk, (2 << 20) // cls_bytes))
    n_slabs = -(-blk // slab)

    scratch_bytes = blk * cls_bytes
    ctx_block_bytes = pad_ctx * pad_d * itemsize
    vmem_limit = int(min(48 << 20,
                         max(scratch_bytes + 2 * ctx_block_bytes + (4 << 20),
                             16 << 20)))

    kernel = functools.partial(_ctx_scatter_kernel, n_cls=n_cls, n_ctx=n_ctx,
                               blk=blk, slab=slab, n_slabs=n_slabs)

    bytes_accessed = (n_cls * n_ctx * D + n_ctx * D) * itemsize
    dim_sem = ("arbitrary",) if n_grid == 1 else ("parallel",)

    return pl.pallas_call(
        kernel,
        out_shape=jax.ShapeDtypeStruct((n_cls, S, D), embedding.dtype),
        grid_spec=pltpu.PrefetchScalarGridSpec(
            num_scalar_prefetch=0,
            grid=(n_grid,),
            in_specs=[
                pl.BlockSpec((n_ctx, D), lambda i: (0, 0)),  # ctx -> VMEM
                pl.BlockSpec(memory_space=pl.ANY),           # embedding (HBM)
            ],
            out_specs=pl.BlockSpec(memory_space=pl.ANY),     # prompts (HBM)
            scratch_shapes=[
                pltpu.VMEM((blk, n_ctx, D), embedding.dtype),
                pltpu.SemaphoreType.DMA((n_slabs,)),
            ],
        ),
        input_output_aliases={1: 0},   # embedding buffer IS the prompts buffer
        compiler_params=pltpu.CompilerParams(
            dimension_semantics=dim_sem,
            vmem_limit_bytes=vmem_limit),
        cost_estimate=pl.CostEstimate(
            flops=0, transcendentals=0, bytes_accessed=bytes_accessed),
    )(ctx, embedding)


if __name__ == "__main__":
    # Small, consistent shapes (CLIP would use S=77, D=512; scaled down here).
    n_cls = 4      # number of class names
    n_ctx = 4      # number of learnable context tokens
    D = 128        # ctx_dim (lane-aligned)
    S = 16         # total tokenized-prompt sequence length

    key = jax.random.PRNGKey(0)
    k_ctx, k_emb = jax.random.split(key)

    # Learnable context vectors: nn.init.normal_(std=0.02), generic (non-CSC).
    ctx = (0.02 * jax.random.normal(k_ctx, (n_ctx, D))).astype(jnp.float32)

    # Stand-in for clip_model.token_embedding(tokenized_prompts):
    # deterministic synthetic embedding table of shape (n_cls, S, D).
    embedding = jax.random.normal(k_emb, (n_cls, S, D), dtype=jnp.float32)

    # Pure-JAX reference (class_token_position == 'end'), built BEFORE the
    # call since `embedding` is donated to the kernel.
    token_prefix = embedding[:, :1, :]            # (n_cls, 1, D)  -- SOS
    token_suffix = embedding[:, 1 + n_ctx:, :]    # (n_cls, S-1-n_ctx, D)
    ctx_b = jnp.broadcast_to(ctx[None, :, :], (n_cls, n_ctx, D))
    ref = jnp.concatenate([token_prefix, ctx_b, token_suffix], axis=1)
    ref = jax.block_until_ready(ref)

    # Donation makes the input_output_alias a true in-place update.
    fwd = jax.jit(prompt_learner_forward, donate_argnums=(1,))
    prompts = jax.block_until_ready(fwd(ctx, embedding))

    assert prompts.shape == (n_cls, S, D), prompts.shape
    assert prompts.dtype == jnp.float32
    assert jnp.allclose(prompts, ref), "Pallas output mismatch vs reference"
    print("KERNEL_OK")
</pallas_src>

<mosaic_0001>
module attributes {stable_mosaic.version = 11 : i64} {
  func.func @_ctx_scatter_kernel(%arg0: i32, %arg1: memref<4x128xf32, #tpu.memory_space<vmem>>, %arg2: memref<4x16x128xf32, #tpu.memory_space<any>>, %arg3: memref<4x16x128xf32, #tpu.memory_space<any>>, %arg4: memref<4x4x128xf32, #tpu.memory_space<vmem>>, %arg5: memref<1x!tpu.dma_semaphore, #tpu.memory_space<semaphore_mem>>) attributes {dimension_semantics = [#tpu.dimension_semantics<arbitrary>], iteration_bounds = array<i64: 1>, scalar_prefetch = 0 : i64, scratch_operands = 2 : i64, tpu.core_type = #tpu.core_type<tc>, window_params = [{pipeline_mode = #tpu.pipeline_mode<synchronous>, transform_indices = @transform_0, window_bounds = array<i64: 4, 128>}, {}, {}]} {
    %c4_i32 = arith.constant 4 : i32
    %0 = arith.muli %arg0, %c4_i32 : i32
    %c0_i32 = arith.constant 0 : i32
    %1 = arith.minsi %0, %c0_i32 : i32
    %c0 = arith.constant 0 : index
    %c0_0 = arith.constant 0 : index
    %2 = vector.load %arg1[%c0, %c0_0] : memref<4x128xf32, #tpu.memory_space<vmem>>, vector<4x128xf32>
    %3 = vector.shape_cast %2 : vector<4x128xf32> to vector<1x4x128xf32>
    %4 = vector.shape_cast %3 : vector<1x4x128xf32> to vector<1x4x128xf32>
    %5 = vector.broadcast %4 : vector<1x4x128xf32> to vector<4x4x128xf32>
    %c0_1 = arith.constant 0 : index
    %c0_2 = arith.constant 0 : index
    %c0_3 = arith.constant 0 : index
    %6 = vector.load %arg4[%c0_1, %c0_2, %c0_3] : memref<4x4x128xf32, #tpu.memory_space<vmem>>, vector<4x4x128xf32>
    tpu.vector_store %arg4[%c0_1, %c0_2, %c0_3], %5 {strides = array<i32>} : memref<4x4x128xf32, #tpu.memory_space<vmem>>, vector<4x4x128xf32>,
    %c0_i32_4 = arith.constant 0 : i32
    %7 = arith.addi %1, %c0_i32_4 : i32
    %c0_i32_5 = arith.constant 0 : i32
    %c0_i32_6 = arith.constant 0 : i32
    %c0_i32_7 = arith.constant 0 : i32
    %c0_i32_8 = arith.constant 0 : i32
    %8 = tpu.memref_slice %arg4[%c0_i32_6, %c0_i32_7, %c0_i32_8] : memref<4x4x128xf32, #tpu.memory_space<vmem>> -> memref<4x4x128xf32, #tpu.memory_space<vmem>>
    %c1_i32 = arith.constant 1 : i32
    %c0_i32_9 = arith.constant 0 : i32
    %9 = tpu.memref_slice %arg3[%7, %c1_i32, %c0_i32_9] : memref<4x16x128xf32, #tpu.memory_space<any>> -> memref<4x4x128xf32, #tpu.memory_space<any>>
    %10 = tpu.memref_slice %arg5[%c0_i32_5] : memref<1x!tpu.dma_semaphore, #tpu.memory_space<semaphore_mem>> -> memref<1x!tpu.dma_semaphore, #tpu.memory_space<semaphore_mem>>
    %11 = tpu.memref_squeeze %10 : memref<1x!tpu.dma_semaphore, #tpu.memory_space<semaphore_mem>> -> memref<!tpu.dma_semaphore, #tpu.memory_space<semaphore_mem>>
    tpu.enqueue_dma source(%8 : memref<4x4x128xf32, #tpu.memory_space<vmem>>) target(%9 : memref<4x4x128xf32, #tpu.memory_space<any>>) target_semaphore(%11 : memref<!tpu.dma_semaphore, #tpu.memory_space<semaphore_mem>>)
    %c0_i32_10 = arith.constant 0 : i32
    %c0_i32_11 = arith.constant 0 : i32
    %c0_i32_12 = arith.constant 0 : i32
    %c0_i32_13 = arith.constant 0 : i32
    %12 = tpu.memref_slice %arg4[%c0_i32_11, %c0_i32_12, %c0_i32_13] : memref<4x4x128xf32, #tpu.memory_space<vmem>> -> memref<4x4x128xf32, #tpu.memory_space<vmem>>
    %c1_i32_14 = arith.constant 1 : i32
    %c0_i32_15 = arith.constant 0 : i32
    %13 = tpu.memref_slice %arg3[%7, %c1_i32_14, %c0_i32_15] : memref<4x16x128xf32, #tpu.memory_space<any>> -> memref<4x4x128xf32, #tpu.memory_space<any>>
    %14 = tpu.memref_slice %arg5[%c0_i32_10] : memref<1x!tpu.dma_semaphore, #tpu.memory_space<semaphore_mem>> -> memref<1x!tpu.dma_semaphore, #tpu.memory_space<semaphore_mem>>
    %15 = tpu.memref_squeeze %14 : memref<1x!tpu.dma_semaphore, #tpu.memory_space<semaphore_mem>> -> memref<!tpu.dma_semaphore, #tpu.memory_space<semaphore_mem>>
    tpu.wait_dma2 semaphore(%15 : memref<!tpu.dma_semaphore, #tpu.memory_space<semaphore_mem>>) src(%12 : memref<4x4x128xf32, #tpu.memory_space<vmem>>) dst(%13 : memref<4x4x128xf32, #tpu.memory_space<any>>)
    return
  }
  func.func @transform_0(%arg0: i32) -> (i32, i32) {
    %c0_i32 = arith.constant 0 : i32
    %c0_i32_0 = arith.constant 0 : i32
    %c0_i32_1 = arith.constant 0 : i32
    return %c0_i32, %c0_i32_0 : i32, i32
  }
}

</mosaic_0001>

<bundles_post_ra>
// kernel: prompt_learner_forward.1
= control target key start
LH: loop header
LB: loop body
LE: loop exit
PB: predicated region body
PF: predicated region fallthrough
CT: control target
= control target key end

     0   :  { %7 = vsyncpa [#allocation5], 0  ;;  %s110_s9 = smov [#allocation4]   ;;  %s167_s0 = inlined_call_operand.hbm [shape: f32[4,128], index: 0, kind: input, shape index: {}]   ;;  %s168_s1 = inlined_call_operand.hbm [shape: f32[4,16,128], index: 1, kind: input, shape index: {}, may-alias: {1,2}]   ;;  %s169_s2 = inlined_call_operand.hbm [shape: f32[4,16,128], index: 2, kind: output, shape index: {}, may-alias: {1,2}]  }
   0x1   :  { %s14_s10 = sshll.u32 %s110_s9, 4  ;;  %s59_s13 = scalar_lea.hbm %s167_s0, 64  ;;  %s15_s10 = int_to_ptr.vmem [resolvable:$true] %s14_s10 }
   0x2   :  { %p60_p0 = scmp.ne.s32.totalorder %s167_s0, %s59_s13  ;;  %p63_p1 = scmp.lt.u32.totalorder %s59_s13, %s167_s0 }
   0x4   :  { %p65_p2 = pnand %p63_p1, %p60_p0 }
   0x6   :  { %68 = shalt.err (!%p65_p2)
}
   0x7   :  { %s69_s1 = scalar_lea.vmem %s15_s10, 64  ;;  %p74_p4 = scmp.lt.s32.totalorder %s15_s10, %s15_s10 }
   0x8   :  { %p70_p3 = scmp.ne.s32.totalorder %s15_s10, %s69_s1  ;;  %p75_p5 = scmp.lt.s32.totalorder %s69_s1, %s69_s1 }
   0xa   :  { %p76_p6 = por %p75_p5, %p74_p4 }
   0xc   :  { %p77_p7 = pnand %p76_p6, %p70_p3 }
   0xe   :  { %80 = shalt.err (!%p77_p7)
}
   0xf   :  { %17 = dma.hbm_to_vmem [thread:$0]  %s167_s0, 64, %s15_s10, [#allocation5]  }
  0x10   :  { %106 = dma.done.wait [#allocation5], 64  }
  0x11   :  { %107 = vsyncadd [#allocation5], 4294967232  ;;  %s111_s20 = smov [#allocation2]   ;;  %s145_s24 = scalar_lea.hbm %s169_s2, 16  ;;  %v24_v0 = vld [vmem:[#allocation4] sm:$0xf] }
  0x12   :  { %s34_s21 = sshll.u32 %s111_s20, 4  ;;  %25 = vst [vmem:[#allocation2] sm:$0xf] %v24_v0  ;;  %26 = vst [vmem:[#allocation2 + $0x4] sm:$0xf] %v24_v0  ;;  %s147_s21 = int_to_ptr.vmem [resolvable:$true] %s34_s21 }
  0x13   :  { %27 = vst [vmem:[#allocation2 + $0x8] sm:$0xf] %v24_v0  ;;  %28 = vst [vmem:[#allocation2 + $0xc] sm:$0xf] %v24_v0  ;;  %s81_s0 = scalar_lea.vmem %s147_s21, 256  ;;  %p86_p9 = scmp.lt.s32.totalorder %s147_s21, %s147_s21 }
  0x14   :  { %p82_p8 = scmp.ne.s32.totalorder %s147_s21, %s81_s0  ;;  %p87_p10 = scmp.lt.s32.totalorder %s81_s0, %s81_s0 }
  0x16   :  { %p88_p11 = por %p87_p10, %p86_p9 }
  0x18   :  { %p89_p12 = pnand %p88_p11, %p82_p8 }
  0x1a   :  { %92 = shalt.err (!%p89_p12)  }
  0x1b   :  { %s105_s27 = scalar_lea.hbm %s169_s2, 272  ;;  %s95_s30 = scalar_lea.hbm %s169_s2, 1024 }
  0x1c   :  { %p94_p13 = scmp.ne.s32.totalorder %s145_s24, %s105_s27  ;;  %p96_p0 = scmp.lt.u32.totalorder %s145_s24, %s169_s2 }
  0x1d   :  { %p97_p1 = scmp.lt.u32.totalorder %s95_s30, %s105_s27  ;;  %p99_p3 = scmp.lt.u32.totalorder %s105_s27, %s145_s24 }
  0x1f   :  { %p98_p2 = por %p97_p1, %p96_p0 }
  0x21   :  { %p100_p4 = por %p99_p3, %p98_p2 }
  0x23   :  { %p101_p5 = pnand %p100_p4, %p94_p13 }
  0x25   :  { %104 = shalt.err (!%p101_p5)  }
  0x26   :  { %s112_s5 = smov 64   ;;  %s113_s6 = smov 256  }
  0x27   :  { %s114_s7 = smov 4  }
  0x28   :  { %37 = dma.vmem_to_hbm [thread:$0]  %s147_s21, 256, %s145_s24, [#allocation3], %s112_s5, %s113_s6, %s114_s7 }
  0x29   :  { %108 = dma.done.wait [#allocation3], 256 }
  0x2a   :  { %109 = vsyncadd [#allocation3], 4294967040 }
  0x2b   :  { %42 = vsyncpa [#allocation5], 1 }
  0x2c   :  { %43 = vsyncmov [#allocation3] }
  0x2f   :  { %s44_s8 = vpop.sfrf %43 }
  0x30   :  { %p53_p6 = scmp.ne.s32.totalorder %s44_s8, 0 }
  0x32   :  { %48 = shalt.err (%p53_p6)  }

</bundles_post_ra>
